<compile_context>
chip_gen: v6e
topology: v6e:2x2x1
jax: 0.10.0
libtpu: 0.0.40
codegen_flags: <defaults>
</compile_context>

<pallas_src>
import functools

import jax
import jax.numpy as jnp
from jax import lax
from jax.experimental import pallas as pl
from jax.experimental.pallas import tpu as pltpu


def _round_up(a, b):
    return ((a + b - 1) // b) * b


def _nona_kernel(x_ref, qaux_ref, xn_ref, naux_ref, y_ref, o_ref, m_s, *,
                 similarity, mask_self, tn, tm, denom_col):
    j = pl.program_id(1)

    @pl.when(j == 0)
    def _():
        m_s[...] = jnp.full_like(m_s, -jnp.inf)
        o_ref[...] = jnp.zeros_like(o_ref)

    x = x_ref[...]          # (tn, D)  f32 query tile (resident across j)
    xn = xn_ref[...]        # (tm, D)  f32 neighbor tile (streamed)
    qaux = qaux_ref[...]    # (tn, 1)  hoisted query-row statistic
    naux = naux_ref[...]    # (1, tm)  hoisted neighbor-row statistic

    # Contract the last dims of both operands -> no transpose through the XLU.
    dn = (((1,), (1,)), ((), ()))
    xdot = lax.dot_general(x, xn, dn, preferred_element_type=jnp.float32)
    if similarity == "euclidean":
        # -||x_i - xn_j||_2 via the quadratic expansion on the MXU.
        # qaux = sum(x^2), naux = sum(xn^2), both precomputed in the wrapper.
        d2 = jnp.maximum(qaux + naux - 2.0 * xdot, 0.0)
        sim = -jnp.sqrt(d2)
    elif similarity == "dot":
        sim = xdot
    elif similarity == "cos":
        # qaux = 1/||x_i||, naux = 1/||xn_j||.
        sim = xdot * qaux * naux
    else:
        raise ValueError(f"unknown similarity {similarity!r}")

    if mask_self:
        # Gate the diagonal self-mask: only run the iota/compare/select when
        # this (i, j) tile's row range actually intersects its column range.
        i = pl.program_id(0)
        row0 = i * tn
        col0 = j * tm
        hit = jnp.logical_and(row0 < col0 + tm, col0 < row0 + tn)

        def _mask_diag(s):
            r = row0 + lax.broadcasted_iota(jnp.int32, s.shape, 0)
            c = col0 + lax.broadcasted_iota(jnp.int32, s.shape, 1)
            return jnp.where(r == c, -jnp.inf, s)

        sim = lax.cond(hit, _mask_diag, lambda s: s, sim)

    # Online softmax across the streamed neighbor tiles. Normalization is
    # deferred; the denominator rides along as y's "ones" column (index
    # denom_col), so no per-step cross-lane row-sum is needed.  Padded
    # neighbor columns have finite sims but all-zero y rows (incl. the ones
    # column), so they contribute nothing to numerator or denominator.
    m_prev = m_s[...]
    m_new = jnp.maximum(m_prev, jnp.max(sim, axis=1, keepdims=True))
    alpha = jnp.exp(m_prev - m_new)                        # (tn, 1)
    p = jnp.exp(sim - m_new).astype(y_ref.dtype)           # (tn, tm) bf16 MXU feed
    o_ref[...] = alpha * o_ref[...] + jnp.dot(
        p, y_ref[...], preferred_element_type=jnp.float32)
    m_s[...] = m_new

    @pl.when(j == pl.num_programs(1) - 1)
    def _():
        acc = o_ref[...]
        l = acc[:, denom_col:denom_col + 1]                 # softmax denominator
        o_ref[...] = acc * pl.reciprocal(l, approx=False)


def _vmem_capacity_bytes():
    try:
        return int(pltpu.get_tpu_info().vmem_capacity_bytes)
    except Exception:
        return 64 << 20      # conservative fallback (v7x: 64 MiB per core)


def nona_forward(x, x_n, y, *, similarity="euclidean", mask_self=None,
                 tn=256, tm=512, class_dtype=jnp.bfloat16):
    """NONA forward: softmax(-cdist(x, x_n)) @ y, self-masked when x is x_n.

    mask_self: pass explicitly when calling under jax.jit (the trace-time
    array_equal auto-detection only happens when called eagerly).
    class_dtype: dtype used to feed the p @ y matmul (bf16 default; pass
    jnp.float32 for an all-f32 aggregation at ~2x the HBM/MXU cost).
    """
    if similarity not in ("euclidean", "dot", "cos"):
        raise ValueError(f"unknown similarity {similarity!r}")

    x = jnp.asarray(x, jnp.float32)
    x_n = jnp.asarray(x_n, jnp.float32)
    y = jnp.asarray(y, jnp.float32)

    N, D = x.shape
    M, Dn = x_n.shape
    assert D == Dn
    My, C = y.shape
    assert My == M

    if mask_self is None:
        # torch.equal(x, x_n); `is` shortcut avoids a device round-trip.
        mask_self = (x.shape == x_n.shape) and (
            (x is x_n) or bool(jnp.array_equal(x, x_n)))

    # Lane-dense class dim; one extra column (index C) hosts the softmax
    # denominator "ones" column.
    # TODO(synk): when C % 128 == 0 this adds one mostly-zero 128-lane block
    # to y; a row-sum fallback would avoid the extra bf16 streaming.
    c_pad = _round_up(C + 1, 128)

    # Tile sizes: 8-aligned query tile, 128-aligned neighbor tile, auto-shrunk
    # to fit the generation-aware VMEM budget (double-buffered inputs).
    tn_eff = min(tn, _round_up(N, 8))
    tm_eff = min(tm, _round_up(M, 128))

    vmem_budget = int(0.72 * _vmem_capacity_bytes())
    y_bytes = jnp.dtype(class_dtype).itemsize

    def vmem_need(tn_, tm_):
        return (2 * (4 * tn_ * D + 4 * tn_               # x, qaux (dbl-buffered)
                     + 4 * tm_ * D + 4 * tm_             # x_n, naux
                     + y_bytes * tm_ * c_pad)            # y
                + 2 * 4 * tn_ * c_pad                    # output block
                + 4 * tn_)                               # running-max scratch

    while vmem_need(tn_eff, tm_eff) > vmem_budget:
        if tm_eff > 128:                                 # shrink tm first: tn
            tm_eff = max(128, _round_up(tm_eff // 2, 128))   # controls re-streaming
        elif tn_eff > 8:
            tn_eff = max(8, _round_up(tn_eff // 2, 8))
        else:
            break

    n_pad = _round_up(N, tn_eff)
    m_pad = _round_up(M, tm_eff)

    xp = jnp.pad(x, ((0, n_pad - N), (0, 0))) if n_pad != N else x
    xnp = jnp.pad(x_n, ((0, m_pad - M), (0, 0))) if m_pad != M else x_n

    # y: zero-padded, lane-dense, MXU-native dtype; column C is 1 for valid
    # neighbors (0 for padded rows) -> acc[:, C] accumulates the softmax denom.
    yp = jnp.zeros((m_pad, c_pad), class_dtype)
    yp = yp.at[:M, :C].set(y.astype(class_dtype))
    yp = yp.at[:M, C].set(jnp.ones((M,), class_dtype))

    # Per-row statistics, computed once (hoisted out of the grid).
    if similarity == "euclidean":
        qaux = jnp.sum(xp * xp, axis=1)[:, None]
        naux = jnp.sum(xnp * xnp, axis=1)[None, :]
    elif similarity == "cos":
        qaux = lax.rsqrt(jnp.sum(xp * xp, axis=1) + 1e-12)[:, None]
        naux = lax.rsqrt(jnp.sum(xnp * xnp, axis=1) + 1e-12)[None, :]
    else:  # dot
        qaux = jnp.zeros((n_pad, 1), jnp.float32)
        naux = jnp.zeros((1, m_pad), jnp.float32)
    qaux = qaux.astype(jnp.float32)
    naux = naux.astype(jnp.float32)

    grid = (n_pad // tn_eff, m_pad // tm_eff)

    kernel = functools.partial(
        _nona_kernel, similarity=similarity, mask_self=mask_self,
        tn=tn_eff, tm=tm_eff, denom_col=C)

    need = vmem_need(tn_eff, tm_eff)
    vmem_limit = int(min(max(2 * need + (4 << 20), 32 << 20), vmem_budget))
    vmem_limit = max(vmem_limit, need + (2 << 20))

    # x / qaux are streamed once; x_n / naux / y are re-streamed per query tile.
    g0 = grid[0]
    cost = pl.CostEstimate(
        flops=2 * n_pad * m_pad * (D + c_pad),
        transcendentals=(2 if similarity == "euclidean" else 1) * n_pad * m_pad,
        bytes_accessed=int(4 * n_pad * (D + 1)
                           + g0 * (4 * m_pad * (D + 1)
                                   + y_bytes * m_pad * c_pad)
                           + 4 * n_pad * c_pad))

    out = pl.pallas_call(
        kernel,
        out_shape=jax.ShapeDtypeStruct((n_pad, c_pad), jnp.float32),
        grid_spec=pltpu.PrefetchScalarGridSpec(
            num_scalar_prefetch=0,
            grid=grid,
            in_specs=[
                pl.BlockSpec((tn_eff, D), lambda i, j: (i, 0)),        # x
                pl.BlockSpec((tn_eff, 1), lambda i, j: (i, 0)),        # qaux
                pl.BlockSpec((tm_eff, D), lambda i, j: (j, 0)),        # x_n
                pl.BlockSpec((1, tm_eff), lambda i, j: (0, j)),        # naux
                pl.BlockSpec((tm_eff, c_pad), lambda i, j: (j, 0)),    # y (bf16)
            ],
            out_specs=pl.BlockSpec((tn_eff, c_pad), lambda i, j: (i, 0)),
            scratch_shapes=[pltpu.VMEM((tn_eff, 1), jnp.float32)]),    # running max
        compiler_params=pltpu.CompilerParams(
            dimension_semantics=("parallel", "arbitrary"),
            vmem_limit_bytes=int(vmem_limit)),
        cost_estimate=cost,
    )(xp, qaux, xnp, naux, yp)

    return out[:N, :C]


def _nona_ref(x, x_n, y, *, similarity="euclidean"):
    """Pure-JAX reference mirroring the PyTorch module (default config)."""
    x = jnp.asarray(x, jnp.float32)
    x_n = jnp.asarray(x_n, jnp.float32)
    y = jnp.asarray(y, jnp.float32)
    if similarity == "euclidean":
        d2 = jnp.sum((x[:, None, :] - x_n[None, :, :]) ** 2, axis=-1)
        sim = -jnp.sqrt(jnp.maximum(d2, 0.0))
    elif similarity == "dot":
        sim = x @ x_n.T
    else:
        xa = x / jnp.linalg.norm(x, axis=1, keepdims=True)
        xb = x_n / jnp.linalg.norm(x_n, axis=1, keepdims=True)
        sim = xa @ xb.T
    if (x.shape == x_n.shape) and bool(jnp.array_equal(x, x_n)):
        sim = jnp.where(jnp.eye(sim.shape[0], dtype=bool), -jnp.inf, sim)
    return jax.nn.softmax(sim, axis=1) @ y


if __name__ == "__main__":
    key = jax.random.PRNGKey(0)
    k1, k2, k3 = jax.random.split(key, 3)

    N, M, D, C = 16, 16, 32, 4
    x = jax.random.normal(k1, (N, D), dtype=jnp.float32)
    x_n = jax.random.normal(k2, (M, D), dtype=jnp.float32)
    labels = jax.random.randint(k3, (M,), 0, C)
    y = jax.nn.one_hot(labels, C, dtype=jnp.float32)   # V = y_train, (M, C)

    # bf16 MXU feed for p @ y perturbs the softmax weights by ~0.2-0.4%
    # (relative), so compare at ~1% tolerance (pass class_dtype=jnp.float32
    # for tighter agreement).
    tol = dict(rtol=1e-2, atol=2e-3)

    # Case 1: distinct train/query sets (no self-masking).
    out = nona_forward(x, x_n, y, similarity="euclidean")
    jax.block_until_ready(out)
    ref = _nona_ref(x, x_n, y, similarity="euclidean")
    assert jnp.allclose(out, ref, **tol)

    # Case 2: x == x_n -> diagonal (self) similarity is masked to -inf.
    out_self = nona_forward(x, x, y, similarity="euclidean")
    jax.block_until_ready(out_self)
    ref_self = _nona_ref(x, x, y, similarity="euclidean")
    assert jnp.allclose(out_self, ref_self, **tol)

    # Case 3: non-tile-aligned, multi-tile on both axes (exercises the online
    # softmax across M tiles, zero-padded neighbors / ones-column denominator,
    # and the output slice-back).
    k4, k5, k6 = jax.random.split(jax.random.PRNGKey(1), 3)
    N2, M2, C2 = 40, 300, 10
    x2 = jax.random.normal(k4, (N2, D), dtype=jnp.float32)
    xn2 = jax.random.normal(k5, (M2, D), dtype=jnp.float32)
    y2 = jax.nn.one_hot(jax.random.randint(k6, (M2,), 0, C2), C2,
                        dtype=jnp.float32)
    out2 = nona_forward(x2, xn2, y2, similarity="euclidean", tn=16, tm=128)
    jax.block_until_ready(out2)
    ref2 = _nona_ref(x2, xn2, y2, similarity="euclidean")
    assert jnp.allclose(out2, ref2, **tol)

    # Case 4: x == x_n with multiple tiles on both axes -> only the (i, j)
    # tiles whose row/col ranges intersect run the gated diagonal self-mask.
    out3 = nona_forward(xn2, xn2, y2, similarity="euclidean", tn=64, tm=128)
    jax.block_until_ready(out3)
    ref3 = _nona_ref(xn2, xn2, y2, similarity="euclidean")
    assert jnp.allclose(out3, ref3, **tol)

    print("KERNEL_OK")
</pallas_src>

<mosaic_0001>
module attributes {stable_mosaic.version = 11 : i64} {
  func.func @_nona_kernel(%arg0: i32, %arg1: i32, %arg2: memref<16x32xf32, #tpu.memory_space<vmem>>, %arg3: memref<16x1xf32, #tpu.memory_space<vmem>>, %arg4: memref<128x32xf32, #tpu.memory_space<vmem>>, %arg5: memref<1x128xf32, #tpu.memory_space<vmem>>, %arg6: memref<128x128xbf16, #tpu.memory_space<vmem>>, %arg7: memref<16x128xf32, #tpu.memory_space<vmem>>, %arg8: memref<16x1xf32, #tpu.memory_space<vmem>>) attributes {dimension_semantics = [#tpu.dimension_semantics<parallel>, #tpu.dimension_semantics<arbitrary>], iteration_bounds = array<i64: 1, 1>, scalar_prefetch = 0 : i64, scratch_operands = 1 : i64, tpu.core_type = #tpu.core_type<tc>, window_params = [{transform_indices = @transform_0, window_bounds = array<i64: 16, 32>}, {transform_indices = @transform_1, window_bounds = array<i64: 16, 1>}, {transform_indices = @transform_2, window_bounds = array<i64: 128, 32>}, {transform_indices = @transform_3, window_bounds = array<i64: 1, 128>}, {transform_indices = @transform_4, window_bounds = array<i64: 128, 128>}, {transform_indices = @transform_5, window_bounds = array<i64: 16, 128>}]} {
    %c0_i32 = arith.constant 0 : i32
    %0 = arith.cmpi eq, %arg1, %c0_i32 : i32
    %1 = arith.extui %0 : i1 to i32
    %c0_i32_0 = arith.constant 0 : i32
    %2 = arith.cmpi ne, %1, %c0_i32_0 : i32
    scf.if %2 {
      %cst_25 = arith.constant 0xFF800000 : f32
      %40 = vector.broadcast %cst_25 : f32 to vector<16x1xf32>
      %c0_26 = arith.constant 0 : index
      %c0_27 = arith.constant 0 : index
      %41 = vector.load %arg8[%c0_26, %c0_27] : memref<16x1xf32, #tpu.memory_space<vmem>>, vector<16x1xf32>
      tpu.vector_store %arg8[%c0_26, %c0_27], %40 {strides = array<i32>} : memref<16x1xf32, #tpu.memory_space<vmem>>, vector<16x1xf32>,
      %cst_28 = arith.constant 0.000000e+00 : f32
      %42 = vector.broadcast %cst_28 : f32 to vector<16x128xf32>
      %c0_29 = arith.constant 0 : index
      %c0_30 = arith.constant 0 : index
      %43 = vector.load %arg7[%c0_29, %c0_30] : memref<16x128xf32, #tpu.memory_space<vmem>>, vector<16x128xf32>
      tpu.vector_store %arg7[%c0_29, %c0_30], %42 {strides = array<i32>} : memref<16x128xf32, #tpu.memory_space<vmem>>, vector<16x128xf32>,
    } else {
    }
    %c0 = arith.constant 0 : index
    %c0_1 = arith.constant 0 : index
    %3 = vector.load %arg2[%c0, %c0_1] : memref<16x32xf32, #tpu.memory_space<vmem>>, vector<16x32xf32>
    %c0_2 = arith.constant 0 : index
    %c0_3 = arith.constant 0 : index
    %4 = vector.load %arg4[%c0_2, %c0_3] : memref<128x32xf32, #tpu.memory_space<vmem>>, vector<128x32xf32>
    %c0_4 = arith.constant 0 : index
    %c0_5 = arith.constant 0 : index
    %5 = vector.load %arg3[%c0_4, %c0_5] : memref<16x1xf32, #tpu.memory_space<vmem>>, vector<16x1xf32>
    %c0_6 = arith.constant 0 : index
    %c0_7 = arith.constant 0 : index
    %6 = vector.load %arg5[%c0_6, %c0_7] : memref<1x128xf32, #tpu.memory_space<vmem>>, vector<1x128xf32>
    %cst = arith.constant dense<0.000000e+00> : vector<16x128xf32>
    %7 = tpu.matmul %3, %4, %cst {dimension_numbers = #tpu.dot_dimension_numbers<[1], [1], [0], [0], [0, 0, 1, 0], [], []>} : vector<16x32xf32>, vector<128x32xf32>, vector<16x128xf32> -> vector<16x128xf32>
    %8 = vector.broadcast %5 : vector<16x1xf32> to vector<16x128xf32>
    %9 = vector.broadcast %6 : vector<1x128xf32> to vector<16x128xf32>
    %10 = arith.addf %8, %9 : vector<16x128xf32>
    %cst_8 = arith.constant 2.000000e+00 : f32
    %11 = vector.broadcast %cst_8 : f32 to vector<16x128xf32>
    %12 = arith.mulf %11, %7 : vector<16x128xf32>
    %13 = arith.subf %10, %12 : vector<16x128xf32>
    %cst_9 = arith.constant 0.000000e+00 : f32
    %14 = vector.broadcast %cst_9 : f32 to vector<16x128xf32>
    %15 = arith.maximumf %13, %14 : vector<16x128xf32>
    %16 = math.sqrt %15 : vector<16x128xf32>
    %cst_10 = arith.constant 0.000000e+00 : f32
    %17 = vector.broadcast %cst_10 : f32 to vector<16x128xf32>
    %18 = arith.subf %17, %16 : vector<16x128xf32>
    %c0_11 = arith.constant 0 : index
    %c0_12 = arith.constant 0 : index
    %19 = vector.load %arg8[%c0_11, %c0_12] : memref<16x1xf32, #tpu.memory_space<vmem>>, vector<16x1xf32>
    %cst_13 = arith.constant dense<0xFF800000> : vector<16xf32>
    %20 = vector.multi_reduction <maximumf>, %18, %cst_13 [1] : vector<16x128xf32> to vector<16xf32>
    %21 = vector.shape_cast %20 : vector<16xf32> to vector<16x1xf32>
    %22 = arith.maximumf %19, %21 : vector<16x1xf32>
    %23 = arith.subf %19, %22 : vector<16x1xf32>
    %24 = math.exp %23 : vector<16x1xf32>
    %25 = vector.broadcast %22 : vector<16x1xf32> to vector<16x128xf32>
    %26 = arith.subf %18, %25 : vector<16x128xf32>
    %27 = math.exp %26 : vector<16x128xf32>
    %28 = arith.truncf %27 : vector<16x128xf32> to vector<16x128xbf16>
    %c0_14 = arith.constant 0 : index
    %c0_15 = arith.constant 0 : index
    %29 = vector.load %arg7[%c0_14, %c0_15] : memref<16x128xf32, #tpu.memory_space<vmem>>, vector<16x128xf32>
    %30 = vector.broadcast %24 : vector<16x1xf32> to vector<16x128xf32>
    %31 = arith.mulf %30, %29 : vector<16x128xf32>
    %c0_16 = arith.constant 0 : index
    %c0_17 = arith.constant 0 : index
    %32 = vector.load %arg6[%c0_16, %c0_17] : memref<128x128xbf16, #tpu.memory_space<vmem>>, vector<128x128xbf16>
    %cst_18 = arith.constant dense<0.000000e+00> : vector<16x128xf32>
    %33 = tpu.matmul %28, %32, %cst_18 {dimension_numbers = #tpu.dot_dimension_numbers<[1], [0], [0], [1], [0, 0, 1, 1], [], []>} : vector<16x128xbf16>, vector<128x128xbf16>, vector<16x128xf32> -> vector<16x128xf32>
    %34 = arith.addf %31, %33 : vector<16x128xf32>
    %c0_19 = arith.constant 0 : index
    %c0_20 = arith.constant 0 : index
    %35 = vector.load %arg7[%c0_19, %c0_20] : memref<16x128xf32, #tpu.memory_space<vmem>>, vector<16x128xf32>
    tpu.vector_store %arg7[%c0_19, %c0_20], %34 {strides = array<i32>} : memref<16x128xf32, #tpu.memory_space<vmem>>, vector<16x128xf32>,
    %c0_21 = arith.constant 0 : index
    %c0_22 = arith.constant 0 : index
    %36 = vector.load %arg8[%c0_21, %c0_22] : memref<16x1xf32, #tpu.memory_space<vmem>>, vector<16x1xf32>
    tpu.vector_store %arg8[%c0_21, %c0_22], %22 {strides = array<i32>} : memref<16x1xf32, #tpu.memory_space<vmem>>, vector<16x1xf32>,
    %c0_i32_23 = arith.constant 0 : i32
    %37 = arith.cmpi eq, %arg1, %c0_i32_23 : i32
    %38 = arith.extui %37 : i1 to i32
    %c0_i32_24 = arith.constant 0 : i32
    %39 = arith.cmpi ne, %38, %c0_i32_24 : i32
    scf.if %39 {
      %c0_25 = arith.constant 0 : index
      %c0_26 = arith.constant 0 : index
      %40 = vector.load %arg7[%c0_25, %c0_26] : memref<16x128xf32, #tpu.memory_space<vmem>>, vector<16x128xf32>
      %41 = vector.extract_strided_slice %40 {offsets = [0, 4], sizes = [16, 1], strides = [1, 1]} : vector<16x128xf32> to vector<16x1xf32>
      %42 = tpu.reciprocal %41 : vector<16x1xf32> -> vector<16x1xf32>
      %43 = vector.broadcast %42 : vector<16x1xf32> to vector<16x128xf32>
      %44 = arith.mulf %40, %43 : vector<16x128xf32>
      %c0_27 = arith.constant 0 : index
      %c0_28 = arith.constant 0 : index
      %45 = vector.load %arg7[%c0_27, %c0_28] : memref<16x128xf32, #tpu.memory_space<vmem>>, vector<16x128xf32>
      tpu.vector_store %arg7[%c0_27, %c0_28], %44 {strides = array<i32>} : memref<16x128xf32, #tpu.memory_space<vmem>>, vector<16x128xf32>,
    } else {
    }
    return
  }
  func.func @transform_0(%arg0: i32, %arg1: i32) -> (i32, i32) {
    %c0_i32 = arith.constant 0 : i32
    %c0_i32_0 = arith.constant 0 : i32
    return %arg0, %c0_i32 : i32, i32
  }
  func.func @transform_1(%arg0: i32, %arg1: i32) -> (i32, i32) {
    %c0_i32 = arith.constant 0 : i32
    %c0_i32_0 = arith.constant 0 : i32
    return %arg0, %c0_i32 : i32, i32
  }
  func.func @transform_2(%arg0: i32, %arg1: i32) -> (i32, i32) {
    %c0_i32 = arith.constant 0 : i32
    %c0_i32_0 = arith.constant 0 : i32
    return %arg1, %c0_i32 : i32, i32
  }
  func.func @transform_3(%arg0: i32, %arg1: i32) -> (i32, i32) {
    %c0_i32 = arith.constant 0 : i32
    %c0_i32_0 = arith.constant 0 : i32
    return %c0_i32, %arg1 : i32, i32
  }
  func.func @transform_4(%arg0: i32, %arg1: i32) -> (i32, i32) {
    %c0_i32 = arith.constant 0 : i32
    %c0_i32_0 = arith.constant 0 : i32
    return %arg1, %c0_i32 : i32, i32
  }
  func.func @transform_5(%arg0: i32, %arg1: i32) -> (i32, i32) {
    %c0_i32 = arith.constant 0 : i32
    %c0_i32_0 = arith.constant 0 : i32
    return %arg0, %c0_i32 : i32, i32
  }
}

</mosaic_0001>

<bundles_post_ra>
// kernel: tpu_custom_call.1
= control target key start
LH: loop header
LB: loop body
LE: loop exit
PB: predicated region body
PF: predicated region fallthrough
CT: control target
= control target key end

     0   :  { %vm52_vm0 = vcmask 261120   ;;  %v583_v2 = vmov 0   ;;  %s749_s0 = inlined_call_operand.vmem [shape: f32[16,32], index: 0, kind: input, shape index: {}]   ;;  %s750_s1 = inlined_call_operand.vmem [shape: f32[16,1], index: 1, kind: input, shape index: {}]   ;;  %s751_s2 = inlined_call_operand.vmem [shape: f32[128,32], index: 2, kind: input, shape index: {}]   ;;  %s752_s3 = inlined_call_operand.vmem [shape: f32[1,128], index: 3, kind: input, shape index: {}]   ;;  %s753_s4 = inlined_call_operand.vmem [shape: bf16[128,128], index: 4, kind: input, shape index: {}]   ;;  %s754_s5 = inlined_call_operand.hbm [shape: f32[16,128], index: 5, kind: output, shape index: {}]  }
   0x1   :  { %v48_v0 = vld [vmem:[%s751_s2 + $0x78] sm:$0xff]  ;;  %v47_v1 = vld [vmem:[%s751_s2 + $0x70] sm:$0xff]  ;;  %533 = vset.pattern.permute.xlu0 %v583_v2  ;;  %534 = vset.pattern.permute.xlu1 %v583_v2  ;;  %v46_v3 = vld [vmem:[%s751_s2 + $0x68] sm:$0xff] }
   0x2   :  { %470 = vmatprep.subr.msk.mxu0 %vm52_vm0, %v48_v0  ;;  %v31_v4 = vld [vmem:[%s749_s0] sm:$0xff]  ;;  %v50_v7 = vld [vmem:[%s750_s1 + $0x8] sm:$0xff]  ;;  %v44_v8 = vld [vmem:[%s751_s2 + $0x58] sm:$0xff] }
   0x3   :  { %471 = vmatpush3.xpose.msk.msra.mxu0 %vm52_vm0, %v48_v0  ;;  %v45_v5 = vld [vmem:[%s751_s2 + $0x60] sm:$0xff]  ;;  %502 = vmatprep.mubr.msk.f32.mxu0 %vm52_vm0, %v31_v4 }
   0x4   :  { %472 = vmatprep.subr.msk.mxu0 %vm52_vm0, %v47_v1  ;;  %v49_v6 = vld [vmem:[%s750_s1] sm:$0xff] }
   0x5   :  { %184 = vperm.xlu0 %533, %v49_v6  }
   0x7   :  { %473 = vmatpush3.xpose.msk.msra.mxu0 %vm52_vm0, %v47_v1 }
   0x8   :  { %474 = vmatprep.subr.msk.mxu0 %vm52_vm0, %v46_v3 }
   0x9   :  { %189 = vperm.xlu0 %533, %v50_v7  }
   0xb   :  { %475 = vmatpush3.xpose.msk.msra.mxu0 %vm52_vm0, %v46_v3 }
   0xc   :  { %476 = vmatprep.subr.msk.mxu0 %vm52_vm0, %v45_v5 }
   0xd   :  { %10 = vsyncpa [#allocation4], 0  ;;  %v43_v9 = vld [vmem:[%s751_s2 + $0x50] sm:$0xff]  ;;  %v42_v10 = vld [vmem:[%s751_s2 + $0x48] sm:$0xff]  ;;  %vm26_vm5 = vcmask 7168   ;;  %v584_v46 = vmov -inf  }
   0xe   :  { %v41_v11 = vld [vmem:[%s751_s2 + $0x40] sm:$0xff]  ;;  %v40_v12 = vld [vmem:[%s751_s2 + $0x38] sm:$0xff]  ;;  %v39_v13 = vld [vmem:[%s751_s2 + $0x30] sm:$0xff]  ;;  %27 = vst.msk [vmem:[#allocation2] sm:$0xff] %vm26_vm5, %v584_v46  ;;  %v585_v48 = vmov 0.0   ;;  %vm586_vm6 = vmmov 0  }
   0xf   :  { %477 = vmatpush3.xpose.msk.msra.mxu0 %vm52_vm0, %v45_v5  ;;  %v38_v14 = vld [vmem:[%s751_s2 + $0x28] sm:$0xff]  ;;  %v37_v15 = vld [vmem:[%s751_s2 + $0x20] sm:$0xff]  ;;  %v36_v16 = vld [vmem:[%s751_s2 + $0x18] sm:$0xff]  ;;  %28 = vst.msk [vmem:[#allocation2 + $0x8] sm:$0xff] %vm26_vm5, %v584_v46  ;;  %505 = vmatprep.subr.bf16.mxu1 %v585_v48 }
  0x10   :  { %478 = vmatprep.subr.msk.mxu0 %vm52_vm0, %v44_v8  ;;  %v35_v17 = vld [vmem:[%s751_s2 + $0x10] sm:$0xff]  ;;  %v34_v18 = vld [vmem:[%s751_s2 + $0x8] sm:$0xff]  ;;  %v33_v19 = vld [vmem:[%s751_s2] sm:$0xff]  ;;  %521 = vmatprep.mubr.msk.bf16.mxu1 %vm586_vm6, %v585_v48 }
  0x11   :  { %v32_v20 = vld [vmem:[%s749_s0 + $0x8] sm:$0xff]  ;;  %v434_v22 = vld [vmem:[%s752_s3] ss:$0 sm:$0xff]  ;;  %v537_v47 = vld [vmem:[%s753_s4 + $0x38] sm:$0xff]  }
  0x12   :  { %506 = vmatpush3.bf16.msra.mxu1 %v537_v47  ;;  %v538_v49 = vld [vmem:[%s753_s4 + $0x30] sm:$0xff]   ;;  %v539_v51 = vld [vmem:[%s753_s4 + $0x28] sm:$0xff]   ;;  %v540_v56 = vld [vmem:[%s753_s4 + $0x20] sm:$0xff]  }
  0x13   :  { %479 = vmatpush3.xpose.msk.msra.mxu0 %vm52_vm0, %v44_v8  ;;  %507 = vmatprep.subr.bf16.mxu1 %v585_v48  ;;  %v541_v61 = vld [vmem:[%s753_s4 + $0x18] sm:$0xff]   ;;  %v542_v63 = vld [vmem:[%s753_s4 + $0x10] sm:$0xff]   ;;  %v543_v0 = vld [vmem:[%s753_s4 + $0x8] sm:$0xff]  }
  0x14   :  { %480 = vmatprep.subr.msk.mxu0 %vm52_vm0, %v43_v9  ;;  %v544_v1 = vld [vmem:[%s753_s4] sm:$0xff]   ;;  %s588_s4 = smov [#allocation3]  }
  0x15   :  { %v222_v50 = vld [vmem:[#allocation2] sm:$0xff]  ;;  %s405_s21 = sshll.u32 %s588_s4, 4  ;;  %s406_s21 = int_to_ptr.vmem [resolvable:$true] %s405_s21 }
  0x16   :  { %508 = vmatpush3.bf16.msra.mxu1 %v538_v49  ;;  %v223_v54 = vld [vmem:[#allocation2 + $0x8] sm:$0xff]  ;;  %s561_s22 = scalar_lea.vmem %s406_s21, 256  ;;  %p566_p1 = scmp.lt.s32.totalorder %s406_s21, %s406_s21 }
  0x17   :  { %481 = vmatpush3.xpose.msk.msra.mxu0 %vm52_vm0, %v43_v9  ;;  %509 = vmatprep.subr.bf16.mxu1 %v585_v48  ;;  %p562_p0 = scmp.ne.s32.totalorder %s406_s21, %s561_s22  ;;  %p567_p2 = scmp.lt.s32.totalorder %s561_s22, %s561_s22 }
  0x18   :  { %482 = vmatprep.subr.msk.mxu0 %vm52_vm0, %v42_v10 }
  0x19   :  { %p568_p3 = por %p567_p2, %p566_p1 }
  0x1a   :  { %510 = vmatpush3.bf16.msra.mxu1 %v539_v51 }
  0x1b   :  { %483 = vmatpush3.xpose.msk.msra.mxu0 %vm52_vm0, %v42_v10  ;;  %511 = vmatprep.subr.bf16.mxu1 %v585_v48  ;;  %p569_p4 = pnand %p568_p3, %p562_p0 }
  0x1c   :  { %484 = vmatprep.subr.msk.mxu0 %vm52_vm0, %v41_v11 }
  0x1e   :  { %512 = vmatpush3.bf16.msra.mxu1 %v540_v56 }
  0x1f   :  { %485 = vmatpush3.xpose.msk.msra.mxu0 %vm52_vm0, %v41_v11  ;;  %513 = vmatprep.subr.bf16.mxu1 %v585_v48 }
  0x20   :  { %486 = vmatprep.subr.msk.mxu0 %vm52_vm0, %v40_v12 }
  0x22   :  { %514 = vmatpush3.bf16.msra.mxu1 %v541_v61 }
  0x23   :  { %487 = vmatpush3.xpose.msk.msra.mxu0 %vm52_vm0, %v40_v12  ;;  %515 = vmatprep.subr.bf16.mxu1 %v585_v48 }
  0x24   :  { %488 = vmatprep.subr.msk.mxu0 %vm52_vm0, %v39_v13 }
  0x26   :  { %516 = vmatpush3.bf16.msra.mxu1 %v542_v63 }
  0x27   :  { %489 = vmatpush3.xpose.msk.msra.mxu0 %vm52_vm0, %v39_v13  ;;  %517 = vmatprep.subr.bf16.mxu1 %v585_v48  ;;  %v587_v13 = vmov 4  }
  0x28   :  { %490 = vmatprep.subr.msk.mxu0 %vm52_vm0, %v38_v14 }
  0x2a   :  { %518 = vmatpush3.bf16.msra.mxu1 %v543_v0 }
  0x2b   :  { %491 = vmatpush3.xpose.msk.msra.mxu0 %vm52_vm0, %v38_v14  ;;  %519 = vmatprep.subr.bf16.mxu1 %v585_v48 }
  0x2c   :  { %492 = vmatprep.subr.msk.mxu0 %vm52_vm0, %v37_v15 }
  0x2e   :  { %520 = vmatpush3.bf16.msra.mxu1 %v544_v1 }
  0x2f   :  { %493 = vmatpush3.xpose.msk.msra.mxu0 %vm52_vm0, %v37_v15 }
  0x30   :  { %494 = vmatprep.subr.msk.mxu0 %vm52_vm0, %v36_v16 }
  0x33   :  { %495 = vmatpush3.xpose.msk.msra.mxu0 %vm52_vm0, %v36_v16 }
  0x34   :  { %496 = vmatprep.subr.msk.mxu0 %vm52_vm0, %v35_v17 }
  0x37   :  { %497 = vmatpush3.xpose.msk.msra.mxu0 %vm52_vm0, %v35_v17 }
  0x38   :  { %498 = vmatprep.subr.msk.mxu0 %vm52_vm0, %v34_v18 }
  0x3b   :  { %499 = vmatpush3.xpose.msk.msra.mxu0 %vm52_vm0, %v34_v18 }
  0x3c   :  { %500 = vmatprep.subr.msk.mxu0 %vm52_vm0, %v33_v19 }
  0x3f   :  { %501 = vmatpush3.xpose.msk.msra.mxu0 %vm52_vm0, %v33_v19 }
  0x42   :  { %503 = vmatmul.mubr.msk.f32.vlgmr.msra.gmra.mxu0 %vm52_vm0, %v32_v20 }
  0x80   :  { %v185_v21 = vpop.permute.xlu0 %184 }
  0x81   :  { %v198_v26 = vadd.f32 %v434_v22, %v185_v21 }
  0x84   :  { %v190_v23 = vpop.permute.xlu0 %189 }
  0x85   :  { %v199_v24 = vadd.f32 %v434_v22, %v190_v23 }
 0x102   :  { %v504_v25 = vpop.f32.mrf.mxu0 }
 0x103   :  { %v201_v27 = vmul.f32 2.0, %v504_v25 }
 0x104   :  { %v173_v28 = vpop.f32.mrf.mxu0 }
 0x105   :  { %v203_v29 = vsub.f32 %v199_v24, %v201_v27  ;;  %v200_v30 = vmul.f32 2.0, %v173_v28 }
 0x107   :  { %v205_v31 = vmax.f32 %v203_v29, 0.0  ;;  %v202_v32 = vsub.f32 %v198_v26, %v200_v30 }
 0x109   :  { %545 = vrsqrt.f32 %v205_v31  ;;  %v204_v33 = vmax.f32 %v202_v32, 0.0  ;;  %vm215_vm2 = vcmp.eq.f32.partialorder %v205_v31, inf  ;;  %v218_v42 = vand.u32 2147483648, %v205_v31 }
 0x10a   :  { %vm217_vm4 = vcmp.eq.f32.partialorder %v205_v31, 0.0 }
 0x10b   :  { %547 = vrsqrt.f32 %v204_v33  ;;  %vm208_vm1 = vcmp.eq.f32.partialorder %v204_v33, inf  ;;  %v211_v38 = vand.u32 2147483648, %v204_v33  ;;  %vm210_vm3 = vcmp.eq.f32.partialorder %v204_v33, 0.0 }
 0x116   :  { %v546_v34 = vpop.eup %545 }
 0x117   :  { %v214_v35 = vmul.f32 %v546_v34, %v205_v31 }
 0x118   :  { %v548_v36 = vpop.eup %547 }
 0x119   :  { %v207_v37 = vmul.f32 %v548_v36, %v204_v33  ;;  %v216_v40 = vsel %vm215_vm2, %v205_v31, %v214_v35 }
 0x11a   :  { %v219_v44 = vsel %vm217_vm4, %v218_v42, %v216_v40 }
 0x11b   :  { %v209_v39 = vsel %vm208_vm1, %v204_v33, %v207_v37  ;;  %v221_v45 = vsub.f32 0.0, %v219_v44 }
 0x11c   :  { %v212_v41 = vsel %vm210_vm3, %v211_v38, %v209_v39 }
 0x11d   :  { %v220_v43 = vsub.f32 0.0, %v212_v41 }
 0x11f   :  { %224 = vmax.xlane.f32.xlu1 %v220_v43 }
 0x123   :  { %226 = vmax.xlane.f32.xlu1 %v221_v45 }
 0x1a8   :  { %v225_v52 = vpop.xlane.xlu1 %224 }
 0x1a9   :  { %v228_v53 = vmax.f32 %v222_v50, %v225_v52 }
 0x1ab   :  { %v230_v55 = vsub.f32 %v222_v50, %v228_v53  ;;  %377 = vst.msk [vmem:[#allocation2] sm:$0xff] %vm26_vm5, %v228_v53  ;;  %238 = vperm.xlu0 %533, %v228_v53  }
 0x1ac   :  { %v227_v57 = vpop.xlane.xlu1 %226 }
 0x1ad   :  { %v232_v58 = vmul.f32 1.442695, %v230_v55  ;;  %v229_v59 = vmax.f32 %v223_v54, %v227_v57 }
 0x1af   :  { %549 = vpow2.f32 %v232_v58  ;;  %v231_v60 = vsub.f32 %v223_v54, %v229_v59  ;;  %378 = vst.msk [vmem:[#allocation2 + $0x8] sm:$0xff] %vm26_vm5, %v229_v59  ;;  %243 = vperm.xlu1 %534, %v229_v59  }
 0x1b1   :  { %v234_v62 = vmul.f32 1.442695, %v231_v60 }
 0x1b3   :  { %551 = vpow2.f32 %v234_v62  ;;  %536 = vset.pattern.permute.xlu1 %v587_v13 }
 0x1bc   :  { %v550_v2 = vpop.eup %549 }
 0x1bd   :  { %257 = vperm.xlu0 %533, %v550_v2  }
 0x1c0   :  { %v552_v3 = vpop.eup %551 }
 0x1c1   :  { %262 = vperm.xlu0 %533, %v552_v3  }
 0x1c5   :  { %535 = vset.pattern.permute.xlu0 %v587_v13 }
 0x226   :  { %v239_v4 = vpop.permute.xlu0 %238 }
 0x227   :  { %v246_v5 = vsub.f32 %v220_v43, %v239_v4 }
 0x229   :  { %v248_v6 = vmul.f32 1.442695, %v246_v5 }
 0x22a   :  { %v244_v7 = vpop.permute.xlu1 %243 }
 0x22b   :  { %v247_v8 = vsub.f32 %v221_v45, %v244_v7  ;;  %553 = vpow2.f32 %v248_v6 }
 0x22d   :  { %v250_v9 = vmul.f32 1.442695, %v247_v8 }
 0x22f   :  { %555 = vpow2.f32 %v250_v9 }
 0x238   :  { %v554_v10 = vpop.eup %553  ;;  %v258_v14 = vpop.permute.xlu0 %257 }
 0x239   :  { %v265_v15 = vmul.f32 0.0, %v258_v14 }
 0x23c   :  { %v556_v11 = vpop.eup %555  ;;  %v263_v16 = vpop.permute.xlu0 %262 }
 0x23d   :  { %v252_v12 = vpack.c.bf16 %v556_v11, %v554_v10  ;;  %v266_v20 = vmul.f32 0.0, %v263_v16 }
 0x23f   :  { %522 = vmatmul.mubr.bf16.vlgmr.msra.gmra.mxu1 %v252_v12 }
 0x2ff   :  { %v365_v17 = vpop.f32.mrf.mxu1 }
 0x300   :  { %v372_v18 = vadd.f32 %v365_v17, %v265_v15 }
 0x301   :  { %v523_v19 = vpop.f32.mrf.mxu1 }
 0x302   :  { %557 = vrcp.f32 %v372_v18 }
 0x303   :  { %v368_v21 = vpop.f32.mrf.mxu1 }
 0x304   :  { %v373_v22 = vadd.f32 %v368_v21, %v266_v20 }
 0x305   :  { %v524_v23 = vpop.f32.mrf.mxu1 }
 0x306   :  { %559 = vrcp.f32 %v373_v22 }
 0x30f   :  { %v558_v24 = vpop.eup %557 }
 0x310   :  { %388 = vperm.xlu0 %535, %v558_v24  }
 0x313   :  { %v560_v25 = vpop.eup %559 }
 0x314   :  { %393 = vperm.xlu1 %536, %v560_v25  }
 0x38b   :  { %v389_v26 = vpop.permute.xlu0 %388 }
 0x38c   :  { %v396_v27 = vmul.f32 %v389_v26, %v372_v18 }
 0x38e   :  { %398 = vst [vmem:[#allocation3] sm:$0xff] %v396_v27 }
 0x38f   :  { %v394_v28 = vpop.permute.xlu1 %393 }
 0x390   :  { %v397_v29 = vmul.f32 %v394_v28, %v373_v22 }
 0x392   :  { %399 = vst [vmem:[#allocation3 + $0x8] sm:$0xff] %v397_v29 }
 0x393   :  { %572 = shalt.err (!%p569_p4)
}
 0x394   :  { %s589_s23 = smov 128   ;;  %s590_s24 = smov 8  }
 0x395   :  { %411 = dma.vmem_to_hbm [thread:$0]  %s406_s21, 256, %s754_s5, [#allocation4], %s589_s23, %s589_s23, %s590_s24  }
 0x396   :  { %581 = dma.done.wait [#allocation4], 256  }
 0x397   :  { %582 = vsyncadd [#allocation4], 4294967040 }
 0x398   :  { %415 = vsyncpa [#allocation4], 1 }

</bundles_post_ra>
